<compile_context>
chip_gen: v7x
topology: tpu7x:2x2x1
jax: 0.10.0
libtpu: 0.0.40
codegen_flags: <defaults>
</compile_context>

<pallas_src>
import functools

import jax
import jax.numpy as jnp
from jax import lax
from jax.experimental import pallas as pl
from jax.experimental.pallas import tpu as pltpu


def _round_up(x: int, m: int) -> int:
    return ((x + m - 1) // m) * m


def _dqn_kernel(x_ref,
                w1_ref, b1_ref,
                w2_ref, b2_ref,
                w3_ref, b3_ref,
                w4_ref, b4_ref,
                out_ref,
                *, apply_softmax_dim0: bool, valid_rows: int):
    """One batch tile of the MLP: 4 MXU matmuls (bf16 operands, f32 accumulate),
    bias adds + ReLUs in f32, optional softmax over the batch axis (dim=0)."""
    x = x_ref[...]  # bf16 [TILE_B, in]

    h = jnp.dot(x, w1_ref[...], preferred_element_type=jnp.float32) + b1_ref[...]
    h = jnp.maximum(h, 0.0).astype(jnp.bfloat16)

    h = jnp.dot(h, w2_ref[...], preferred_element_type=jnp.float32) + b2_ref[...]
    h = jnp.maximum(h, 0.0).astype(jnp.bfloat16)

    h = jnp.dot(h, w3_ref[...], preferred_element_type=jnp.float32) + b3_ref[...]
    h = jnp.maximum(h, 0.0).astype(jnp.bfloat16)

    logits = jnp.dot(h, w4_ref[...], preferred_element_type=jnp.float32) + b4_ref[...]

    if apply_softmax_dim0:
        # F.softmax(actions, dim=0): softmax over the batch axis.  Mask any padded
        # rows so they do not contribute to the per-column max / denominator.
        row = lax.broadcasted_iota(jnp.int32, logits.shape, 0)
        masked = jnp.where(row < valid_rows, logits, jnp.float32(-1e30))
        m = jnp.max(masked, axis=0, keepdims=True)
        e = jnp.exp(masked - m)
        denom = jnp.sum(e, axis=0, keepdims=True)
        logits = e * pl.reciprocal(denom, approx=True)

    out_ref[...] = logits.astype(out_ref.dtype)


def _default_tile_b_cap(input_dims: int, hidden_dims: int, n_pad: int) -> int:
    """Generation-aware batch-tile cap from VMEM capacity (v7x has 64 MiB, v5e/v6e 128)."""
    try:
        vmem = pltpu.get_tpu_info().vmem_capacity_bytes
    except Exception:  # not on TPU / query unavailable: assume the smallest (v7x).
        vmem = 64 << 20
    # Budget: stay well inside the default scoped VMEM limit.
    budget = min(vmem, 32 << 20) // 2
    # Per-row bytes: double-buffered bf16 x + double-buffered f32 out + f32 intermediates.
    per_row = 2 * 2 * input_dims + 2 * 4 * n_pad + 4 * 3 * hidden_dims
    cap = budget // max(per_row, 1)
    cap = max(8, min(16384, (cap // 8) * 8))
    return cap


def dqn_forward(x, params, agent_type=None, tile_b_cap=None):
    """x: [batch, input_dims] float32.  params: dict of (w_i, b_i) with
    w_i: [in, out] (transposed from nn.Linear's [out, in]), b_i: [1, out]."""
    batch, input_dims = x.shape
    fc1 = params["w1"].shape[1]
    fc2 = params["w2"].shape[1]
    fc3 = params["w3"].shape[1]
    n_actions = params["w4"].shape[1]

    # Lane-dense output: pad the fc4 output axis up to a multiple of 128 lanes.
    n_pad = _round_up(max(n_actions, 128), 128)

    if tile_b_cap is None:
        tile_b_cap = _default_tile_b_cap(input_dims, max(fc1, fc2, fc3), n_pad)
    tile_b = min(_round_up(batch, 8), max(8, (tile_b_cap // 8) * 8))
    pad_b = _round_up(batch, tile_b)
    num_tiles = pad_b // tile_b

    # Softmax over dim=0 is a cross-tile reduction: only fuse it into the kernel when
    # the whole (padded) batch lives in a single tile; otherwise apply it in the wrapper.
    softmax_in_kernel = (agent_type == 2) and (num_tiles == 1)

    # bf16 matmul operands (halves MXU work and x-tile DMA traffic); biases stay f32.
    x_in = x
    if pad_b != batch:
        x_in = jnp.pad(x_in, ((0, pad_b - batch), (0, 0)))
    x_in = x_in.astype(jnp.bfloat16)

    w1 = params["w1"].astype(jnp.bfloat16)
    w2 = params["w2"].astype(jnp.bfloat16)
    w3 = params["w3"].astype(jnp.bfloat16)
    w4 = params["w4"]
    b4 = params["b4"]
    if n_pad != n_actions:
        w4 = jnp.pad(w4, ((0, 0), (0, n_pad - n_actions)))
        b4 = jnp.pad(b4, ((0, 0), (0, n_pad - n_actions)))
    w4 = w4.astype(jnp.bfloat16)
    b1, b2, b3 = params["b1"], params["b2"], params["b3"]

    kernel = functools.partial(_dqn_kernel,
                               apply_softmax_dim0=softmax_in_kernel,
                               valid_rows=batch)

    # x / out tiled over the batch grid axis; weights & biases VMEM-resident (constant
    # index_map -> DMA'd once, re-used every grid step).
    in_specs = [
        pl.BlockSpec((tile_b, input_dims), lambda i: (i, 0)),
        pl.BlockSpec(w1.shape, lambda i: (0, 0)),
        pl.BlockSpec(b1.shape, lambda i: (0, 0)),
        pl.BlockSpec(w2.shape, lambda i: (0, 0)),
        pl.BlockSpec(b2.shape, lambda i: (0, 0)),
        pl.BlockSpec(w3.shape, lambda i: (0, 0)),
        pl.BlockSpec(b3.shape, lambda i: (0, 0)),
        pl.BlockSpec(w4.shape, lambda i: (0, 0)),
        pl.BlockSpec(b4.shape, lambda i: (0, 0)),
    ]
    out_specs = pl.BlockSpec((tile_b, n_pad), lambda i: (i, 0))

    flops = 2 * pad_b * (input_dims * fc1 + fc1 * fc2 + fc2 * fc3 + fc3 * n_pad)
    transcendentals = pad_b * n_pad if softmax_in_kernel else 0
    bytes_accessed = (x_in.size * 2
                      + (w1.size + w2.size + w3.size + w4.size) * 2
                      + (b1.size + b2.size + b3.size + b4.size) * 4
                      + pad_b * n_pad * 4)

    out = pl.pallas_call(
        kernel,
        out_shape=jax.ShapeDtypeStruct((pad_b, n_pad), jnp.float32),
        grid=(num_tiles,),
        in_specs=in_specs,
        out_specs=out_specs,
        compiler_params=pltpu.CompilerParams(
            dimension_semantics=("parallel",)),
        cost_estimate=pl.CostEstimate(flops=flops,
                                      transcendentals=transcendentals,
                                      bytes_accessed=bytes_accessed),
    )(x_in, w1, b1, w2, b2, w3, b3, w4, b4)

    actions = out[:batch, :n_actions]
    if agent_type == 2 and not softmax_in_kernel:
        # Cross-tile dim-0 softmax applied on the kernel's logits (kept outside the
        # kernel because each grid step only sees one batch tile).
        actions = jax.nn.softmax(actions, axis=0)
    return actions


def init_params(key, input_dims, fc1_dims, fc2_dims, fc3_dims, n_actions):
    """Deterministic PyTorch-nn.Linear-style init (uniform(-1/sqrt(fan_in), +))."""
    dims = [input_dims, fc1_dims, fc2_dims, fc3_dims, n_actions]
    params = {}
    keys = jax.random.split(key, 8)
    for i in range(4):
        fan_in, fan_out = dims[i], dims[i + 1]
        bound = 1.0 / (fan_in ** 0.5)
        w = jax.random.uniform(keys[2 * i], (fan_in, fan_out),
                               minval=-bound, maxval=bound, dtype=jnp.float32)
        b = jax.random.uniform(keys[2 * i + 1], (1, fan_out),
                               minval=-bound, maxval=bound, dtype=jnp.float32)
        params[f"w{i + 1}"] = w
        params[f"b{i + 1}"] = b
    return params


def _reference_forward(x, params, agent_type=None):
    h = x
    for i in range(1, 4):
        h = jnp.maximum(h @ params[f"w{i}"] + params[f"b{i}"], 0.0)
    actions = h @ params["w4"] + params["b4"]
    if agent_type == 2:
        actions = jax.nn.softmax(actions, axis=0)
    return actions


if __name__ == "__main__":
    key = jax.random.PRNGKey(0)
    k_param, k_x, k_x2 = jax.random.split(key, 3)

    # Small shapes implied by the module: input_dims=(16,), fc1/2/3=32, n_actions=4.
    batch, input_dims, fc1, fc2, fc3, n_actions = 8, 16, 32, 32, 32, 4

    params = init_params(k_param, input_dims, fc1, fc2, fc3, n_actions)
    x = jax.random.normal(k_x, (batch, input_dims), dtype=jnp.float32)

    # bf16 matmul operands + approx reciprocal -> loosened tolerances vs f32 reference.
    TOL = dict(atol=3e-2, rtol=3e-2)

    # Default path (agent_type=None): plain Q-values, single batch tile.
    out = jax.block_until_ready(dqn_forward(x, params, agent_type=None))
    ref = _reference_forward(x, params, agent_type=None)
    assert out.shape == (batch, n_actions)
    assert jnp.allclose(out, ref, **TOL), "agent_type=None mismatch"

    # agent_type == 2: softmax over dim=0 (batch axis), fused in-kernel (single tile).
    out_sm = jax.block_until_ready(dqn_forward(x, params, agent_type=2))
    ref_sm = _reference_forward(x, params, agent_type=2)
    assert jnp.allclose(out_sm, ref_sm, **TOL), "agent_type=2 mismatch"

    # Multi-tile grid path (replay-sized batches): force 3 tiles of 8 rows.
    x_big = jax.random.normal(k_x2, (24, input_dims), dtype=jnp.float32)
    out_big = jax.block_until_ready(
        dqn_forward(x_big, params, agent_type=None, tile_b_cap=8))
    ref_big = _reference_forward(x_big, params, agent_type=None)
    assert jnp.allclose(out_big, ref_big, **TOL), "multi-tile mismatch"

    # Multi-tile + agent_type==2: dim-0 softmax applied cross-tile in the wrapper.
    out_big_sm = jax.block_until_ready(
        dqn_forward(x_big, params, agent_type=2, tile_b_cap=8))
    ref_big_sm = _reference_forward(x_big, params, agent_type=2)
    assert jnp.allclose(out_big_sm, ref_big_sm, **TOL), "multi-tile softmax mismatch"

    print("KERNEL_OK")
</pallas_src>

<mosaic_0001>
module attributes {stable_mosaic.version = 11 : i64} {
  func.func @_dqn_kernel(%arg0: i32, %arg1: memref<8x16xbf16, #tpu.memory_space<vmem>>, %arg2: memref<16x32xbf16, #tpu.memory_space<vmem>>, %arg3: memref<1x32xf32, #tpu.memory_space<vmem>>, %arg4: memref<32x32xbf16, #tpu.memory_space<vmem>>, %arg5: memref<1x32xf32, #tpu.memory_space<vmem>>, %arg6: memref<32x32xbf16, #tpu.memory_space<vmem>>, %arg7: memref<1x32xf32, #tpu.memory_space<vmem>>, %arg8: memref<32x128xbf16, #tpu.memory_space<vmem>>, %arg9: memref<1x128xf32, #tpu.memory_space<vmem>>, %arg10: memref<8x128xf32, #tpu.memory_space<vmem>>) attributes {dimension_semantics = [#tpu.dimension_semantics<parallel>], iteration_bounds = array<i64: 1>, scalar_prefetch = 0 : i64, scratch_operands = 0 : i64, tpu.core_type = #tpu.core_type<tc>, window_params = [{transform_indices = @transform_0, window_bounds = array<i64: 8, 16>}, {pipeline_mode = #tpu.pipeline_mode<synchronous>, transform_indices = @transform_1, window_bounds = array<i64: 16, 32>}, {pipeline_mode = #tpu.pipeline_mode<synchronous>, transform_indices = @transform_2, window_bounds = array<i64: 1, 32>}, {pipeline_mode = #tpu.pipeline_mode<synchronous>, transform_indices = @transform_3, window_bounds = array<i64: 32, 32>}, {pipeline_mode = #tpu.pipeline_mode<synchronous>, transform_indices = @transform_4, window_bounds = array<i64: 1, 32>}, {pipeline_mode = #tpu.pipeline_mode<synchronous>, transform_indices = @transform_5, window_bounds = array<i64: 32, 32>}, {pipeline_mode = #tpu.pipeline_mode<synchronous>, transform_indices = @transform_6, window_bounds = array<i64: 1, 32>}, {pipeline_mode = #tpu.pipeline_mode<synchronous>, transform_indices = @transform_7, window_bounds = array<i64: 32, 128>}, {pipeline_mode = #tpu.pipeline_mode<synchronous>, transform_indices = @transform_8, window_bounds = array<i64: 1, 128>}, {transform_indices = @transform_9, window_bounds = array<i64: 8, 128>}]} {
    %c0 = arith.constant 0 : index
    %c0_0 = arith.constant 0 : index
    %0 = vector.load %arg1[%c0, %c0_0] : memref<8x16xbf16, #tpu.memory_space<vmem>>, vector<8x16xbf16>
    %c0_1 = arith.constant 0 : index
    %c0_2 = arith.constant 0 : index
    %1 = vector.load %arg2[%c0_1, %c0_2] : memref<16x32xbf16, #tpu.memory_space<vmem>>, vector<16x32xbf16>
    %cst = arith.constant dense<0.000000e+00> : vector<8x32xf32>
    %2 = tpu.matmul %0, %1, %cst {dimension_numbers = #tpu.dot_dimension_numbers<[1], [0], [0], [1], [0, 0, 1, 1], [], []>} : vector<8x16xbf16>, vector<16x32xbf16>, vector<8x32xf32> -> vector<8x32xf32>
    %c0_3 = arith.constant 0 : index
    %c0_4 = arith.constant 0 : index
    %3 = vector.load %arg3[%c0_3, %c0_4] : memref<1x32xf32, #tpu.memory_space<vmem>>, vector<1x32xf32>
    %4 = vector.broadcast %3 : vector<1x32xf32> to vector<8x32xf32>
    %5 = arith.addf %2, %4 : vector<8x32xf32>
    %cst_5 = arith.constant 0.000000e+00 : f32
    %6 = vector.broadcast %cst_5 : f32 to vector<8x32xf32>
    %7 = arith.maximumf %5, %6 : vector<8x32xf32>
    %8 = arith.truncf %7 : vector<8x32xf32> to vector<8x32xbf16>
    %c0_6 = arith.constant 0 : index
    %c0_7 = arith.constant 0 : index
    %9 = vector.load %arg4[%c0_6, %c0_7] : memref<32x32xbf16, #tpu.memory_space<vmem>>, vector<32x32xbf16>
    %cst_8 = arith.constant dense<0.000000e+00> : vector<8x32xf32>
    %10 = tpu.matmul %8, %9, %cst_8 {dimension_numbers = #tpu.dot_dimension_numbers<[1], [0], [0], [1], [0, 0, 1, 1], [], []>} : vector<8x32xbf16>, vector<32x32xbf16>, vector<8x32xf32> -> vector<8x32xf32>
    %c0_9 = arith.constant 0 : index
    %c0_10 = arith.constant 0 : index
    %11 = vector.load %arg5[%c0_9, %c0_10] : memref<1x32xf32, #tpu.memory_space<vmem>>, vector<1x32xf32>
    %12 = vector.broadcast %11 : vector<1x32xf32> to vector<8x32xf32>
    %13 = arith.addf %10, %12 : vector<8x32xf32>
    %cst_11 = arith.constant 0.000000e+00 : f32
    %14 = vector.broadcast %cst_11 : f32 to vector<8x32xf32>
    %15 = arith.maximumf %13, %14 : vector<8x32xf32>
    %16 = arith.truncf %15 : vector<8x32xf32> to vector<8x32xbf16>
    %c0_12 = arith.constant 0 : index
    %c0_13 = arith.constant 0 : index
    %17 = vector.load %arg6[%c0_12, %c0_13] : memref<32x32xbf16, #tpu.memory_space<vmem>>, vector<32x32xbf16>
    %cst_14 = arith.constant dense<0.000000e+00> : vector<8x32xf32>
    %18 = tpu.matmul %16, %17, %cst_14 {dimension_numbers = #tpu.dot_dimension_numbers<[1], [0], [0], [1], [0, 0, 1, 1], [], []>} : vector<8x32xbf16>, vector<32x32xbf16>, vector<8x32xf32> -> vector<8x32xf32>
    %c0_15 = arith.constant 0 : index
    %c0_16 = arith.constant 0 : index
    %19 = vector.load %arg7[%c0_15, %c0_16] : memref<1x32xf32, #tpu.memory_space<vmem>>, vector<1x32xf32>
    %20 = vector.broadcast %19 : vector<1x32xf32> to vector<8x32xf32>
    %21 = arith.addf %18, %20 : vector<8x32xf32>
    %cst_17 = arith.constant 0.000000e+00 : f32
    %22 = vector.broadcast %cst_17 : f32 to vector<8x32xf32>
    %23 = arith.maximumf %21, %22 : vector<8x32xf32>
    %24 = arith.truncf %23 : vector<8x32xf32> to vector<8x32xbf16>
    %c0_18 = arith.constant 0 : index
    %c0_19 = arith.constant 0 : index
    %25 = vector.load %arg8[%c0_18, %c0_19] : memref<32x128xbf16, #tpu.memory_space<vmem>>, vector<32x128xbf16>
    %cst_20 = arith.constant dense<0.000000e+00> : vector<8x128xf32>
    %26 = tpu.matmul %24, %25, %cst_20 {dimension_numbers = #tpu.dot_dimension_numbers<[1], [0], [0], [1], [0, 0, 1, 1], [], []>} : vector<8x32xbf16>, vector<32x128xbf16>, vector<8x128xf32> -> vector<8x128xf32>
    %c0_21 = arith.constant 0 : index
    %c0_22 = arith.constant 0 : index
    %27 = vector.load %arg9[%c0_21, %c0_22] : memref<1x128xf32, #tpu.memory_space<vmem>>, vector<1x128xf32>
    %28 = vector.broadcast %27 : vector<1x128xf32> to vector<8x128xf32>
    %29 = arith.addf %26, %28 : vector<8x128xf32>
    %c0_23 = arith.constant 0 : index
    %c0_24 = arith.constant 0 : index
    %30 = vector.load %arg10[%c0_23, %c0_24] : memref<8x128xf32, #tpu.memory_space<vmem>>, vector<8x128xf32>
    tpu.vector_store %arg10[%c0_23, %c0_24], %29 {strides = array<i32>} : memref<8x128xf32, #tpu.memory_space<vmem>>, vector<8x128xf32>,
    return
  }
  func.func @transform_0(%arg0: i32) -> (i32, i32) {
    %c0_i32 = arith.constant 0 : i32
    %c0_i32_0 = arith.constant 0 : i32
    return %arg0, %c0_i32 : i32, i32
  }
  func.func @transform_1(%arg0: i32) -> (i32, i32) {
    %c0_i32 = arith.constant 0 : i32
    %c0_i32_0 = arith.constant 0 : i32
    %c0_i32_1 = arith.constant 0 : i32
    return %c0_i32, %c0_i32_0 : i32, i32
  }
  func.func @transform_2(%arg0: i32) -> (i32, i32) {
    %c0_i32 = arith.constant 0 : i32
    %c0_i32_0 = arith.constant 0 : i32
    %c0_i32_1 = arith.constant 0 : i32
    return %c0_i32, %c0_i32_0 : i32, i32
  }
  func.func @transform_3(%arg0: i32) -> (i32, i32) {
    %c0_i32 = arith.constant 0 : i32
    %c0_i32_0 = arith.constant 0 : i32
    %c0_i32_1 = arith.constant 0 : i32
    return %c0_i32, %c0_i32_0 : i32, i32
  }
  func.func @transform_4(%arg0: i32) -> (i32, i32) {
    %c0_i32 = arith.constant 0 : i32
    %c0_i32_0 = arith.constant 0 : i32
    %c0_i32_1 = arith.constant 0 : i32
    return %c0_i32, %c0_i32_0 : i32, i32
  }
  func.func @transform_5(%arg0: i32) -> (i32, i32) {
    %c0_i32 = arith.constant 0 : i32
    %c0_i32_0 = arith.constant 0 : i32
    %c0_i32_1 = arith.constant 0 : i32
    return %c0_i32, %c0_i32_0 : i32, i32
  }
  func.func @transform_6(%arg0: i32) -> (i32, i32) {
    %c0_i32 = arith.constant 0 : i32
    %c0_i32_0 = arith.constant 0 : i32
    %c0_i32_1 = arith.constant 0 : i32
    return %c0_i32, %c0_i32_0 : i32, i32
  }
  func.func @transform_7(%arg0: i32) -> (i32, i32) {
    %c0_i32 = arith.constant 0 : i32
    %c0_i32_0 = arith.constant 0 : i32
    %c0_i32_1 = arith.constant 0 : i32
    return %c0_i32, %c0_i32_0 : i32, i32
  }
  func.func @transform_8(%arg0: i32) -> (i32, i32) {
    %c0_i32 = arith.constant 0 : i32
    %c0_i32_0 = arith.constant 0 : i32
    %c0_i32_1 = arith.constant 0 : i32
    return %c0_i32, %c0_i32_0 : i32, i32
  }
  func.func @transform_9(%arg0: i32) -> (i32, i32) {
    %c0_i32 = arith.constant 0 : i32
    %c0_i32_0 = arith.constant 0 : i32
    return %arg0, %c0_i32 : i32, i32
  }
}

</mosaic_0001>

<bundles_post_ra>
// kernel: tpu_custom_call.1
= control target key start
LH: loop header
LB: loop body
LE: loop exit
PB: predicated region body
PF: predicated region fallthrough
CT: control target
= control target key end

     0   :  { %14 = vsyncpa [#allocation3], 0  ;;  %s713_s0 = inlined_call_operand.hbm [shape: bf16[8,16], index: 0, kind: input, shape index: {}]   ;;  %s714_s1 = inlined_call_operand.hbm [shape: bf16[16,32], index: 1, kind: input, shape index: {}]   ;;  %s715_s2 = inlined_call_operand.vmem [shape: f32[1,32], index: 2, kind: input, shape index: {}]   ;;  %s716_s3 = inlined_call_operand.hbm [shape: bf16[32,32], index: 3, kind: input, shape index: {}]   ;;  %s717_s4 = inlined_call_operand.vmem [shape: f32[1,32], index: 4, kind: input, shape index: {}]   ;;  %s718_s5 = inlined_call_operand.vmem [shape: bf16[32,32], index: 5, kind: input, shape index: {}]   ;;  %s719_s6 = inlined_call_operand.vmem [shape: f32[1,32], index: 6, kind: input, shape index: {}]   ;;  %s720_s7 = inlined_call_operand.hbm [shape: bf16[32,128], index: 7, kind: input, shape index: {}]   ;;  %s721_s8 = inlined_call_operand.vmem [shape: f32[1,128], index: 8, kind: input, shape index: {}]   ;;  %s722_s9 = inlined_call_operand.hbm [shape: f32[8,128], index: 9, kind: output, shape index: {}]  }
   0x1   :  { %15 = vsyncpa [#allocation6], 0 }
   0x2   :  { %16 = vsyncpa [#allocation9], 0 }
   0x3   :  { %17 = vsyncpa [#allocation4], 0  ;;  %s560_s30 = smov [#allocation5]   ;;  %s442_s13 = scalar_lea.hbm %s714_s1, 128 }
   0x4   :  { %s33_s10 = sshll.u32 %s560_s30, 4  ;;  %p443_p0 = scmp.ne.s32.totalorder %s714_s1, %s442_s13  ;;  %s34_s10 = int_to_ptr.vmem [resolvable:$true] %s33_s10 }
   0x5   :  { %p446_p1 = scmp.lt.u32.totalorder %s442_s13, %s714_s1 }
   0x7   :  { %p448_p2 = pnand %p446_p1, %p443_p0 }
   0x9   :  { %451 = shalt.err (!%p448_p2)
}
   0xa   :  { %s452_s18 = scalar_lea.vmem %s34_s10, 128  ;;  %p457_p4 = scmp.lt.s32.totalorder %s34_s10, %s34_s10 }
   0xb   :  { %p453_p3 = scmp.ne.s32.totalorder %s34_s10, %s452_s18  ;;  %p458_p5 = scmp.lt.s32.totalorder %s452_s18, %s452_s18 }
   0xd   :  { %p459_p6 = por %p458_p5, %p457_p4 }
   0xf   :  { %p460_p7 = pnand %p459_p6, %p453_p3 }
  0x11   :  { %463 = shalt.err (!%p460_p7)
}
  0x12   :  { %s561_s19 = smov 64   ;;  %s562_s20 = smov 4  }
  0x13   :  { %39 = dma.hbm_to_vmem [thread:$0]  %s714_s1, 128, %s34_s10, [#allocation6], %s561_s19, %s561_s19, %s562_s20  }
  0x14   :  { %s563_s23 = smov [#allocation2]   ;;  %s564_s25 = smov [#allocation7]  }
  0x15   :  { %s24_s24 = sshll.u32 %s563_s23, 4  ;;  %s47_s26 = sshll.u32 %s564_s25, 4  ;;  %s25_s24 = int_to_ptr.vmem [resolvable:$true] %s24_s24  ;;  %s48_s26 = int_to_ptr.vmem [resolvable:$true] %s47_s26 }
  0x16   :  { %s464_s29 = scalar_lea.hbm %s713_s0, 64 }
  0x17   :  { %p465_p8 = scmp.ne.s32.totalorder %s713_s0, %s464_s29  ;;  %p468_p9 = scmp.lt.u32.totalorder %s464_s29, %s713_s0 }
  0x19   :  { %p470_p10 = pnand %p468_p9, %p465_p8 }
  0x1b   :  { %473 = shalt.err (!%p470_p10)
}
  0x1c   :  { %s474_s1 = scalar_lea.vmem %s25_s24, 64  ;;  %p479_p12 = scmp.lt.s32.totalorder %s25_s24, %s25_s24 }
  0x1d   :  { %p475_p11 = scmp.ne.s32.totalorder %s25_s24, %s474_s1  ;;  %p480_p13 = scmp.lt.s32.totalorder %s474_s1, %s474_s1 }
  0x1f   :  { %p481_p0 = por %p480_p13, %p479_p12 }
  0x21   :  { %p482_p1 = pnand %p481_p0, %p475_p11 }
  0x23   :  { %485 = shalt.err (!%p482_p1)
}
  0x24   :  { %27 = dma.hbm_to_vmem [thread:$0]  %s713_s0, 64, %s25_s24, [#allocation3]  }
  0x25   :  { %s486_s17 = scalar_lea.hbm %s716_s3, 256 }
  0x26   :  { %p487_p2 = scmp.ne.s32.totalorder %s716_s3, %s486_s17  ;;  %p490_p3 = scmp.lt.u32.totalorder %s486_s17, %s716_s3 }
  0x28   :  { %p492_p4 = pnand %p490_p3, %p487_p2 }
  0x2a   :  { %495 = shalt.err (!%p492_p4)
}
  0x2b   :  { %s496_s25 = scalar_lea.vmem %s48_s26, 256  ;;  %p501_p6 = scmp.lt.s32.totalorder %s48_s26, %s48_s26 }
  0x2c   :  { %p497_p5 = scmp.ne.s32.totalorder %s48_s26, %s496_s25  ;;  %p502_p7 = scmp.lt.s32.totalorder %s496_s25, %s496_s25 }
  0x2e   :  { %p503_p8 = por %p502_p7, %p501_p6 }
  0x30   :  { %p504_p9 = pnand %p503_p8, %p497_p5 }
  0x32   :  { %507 = shalt.err (!%p504_p9)
}
  0x33   :  { %53 = dma.hbm_to_vmem [thread:$0]  %s716_s3, 256, %s48_s26, [#allocation6], %s561_s19, %s561_s19, %s562_s20  }
  0x34   :  { %s565_s27 = smov [#allocation8]   ;;  %s508_s11 = scalar_lea.hbm %s720_s7, 256 }
  0x35   :  { %s65_s28 = sshll.u32 %s565_s27, 4  ;;  %p509_p10 = scmp.ne.s32.totalorder %s720_s7, %s508_s11  ;;  %s66_s28 = int_to_ptr.vmem [resolvable:$true] %s65_s28 }
  0x36   :  { %p512_p11 = scmp.lt.u32.totalorder %s508_s11, %s720_s7 }
  0x38   :  { %p514_p12 = pnand %p512_p11, %p509_p10 }
  0x3a   :  { %517 = shalt.err (!%p514_p12)
}
  0x3b   :  { %s518_s14 = scalar_lea.vmem %s66_s28, 256  ;;  %p523_p0 = scmp.lt.s32.totalorder %s66_s28, %s66_s28 }
  0x3c   :  { %p519_p13 = scmp.ne.s32.totalorder %s66_s28, %s518_s14  ;;  %p524_p1 = scmp.lt.s32.totalorder %s518_s14, %s518_s14 }
  0x3e   :  { %p525_p2 = por %p524_p1, %p523_p0 }
  0x40   :  { %p526_p3 = pnand %p525_p2, %p519_p13 }
  0x42   :  { %529 = shalt.err (!%p526_p3)
}
  0x43   :  { %71 = dma.hbm_to_vmem [thread:$0]  %s720_s7, 256, %s66_s28, [#allocation9], %s561_s19, %s561_s19, %s562_s20  }
  0x44   :  { %552 = dma.done.wait [#allocation3], 64  }
  0x45   :  { %553 = vsyncadd [#allocation3], 4294967232 }
  0x46   :  { %554 = dma.done.wait [#allocation6], 384  }
  0x47   :  { %555 = vsyncadd [#allocation6], 4294966912 }
  0x48   :  { %556 = dma.done.wait [#allocation9], 256  }
  0x49   :  { %557 = vsyncadd [#allocation9], 4294967040  ;;  %v566_v0 = vmov 0.0   ;;  %vm567_vm0 = vmmov 0   ;;  %v435_v1 = vld [vmem:[#allocation5] sm:$0xff]   ;;  %vm103_vm1 = vcmask 130048  }
  0x4a   :  { %396 = vmatprep.subr.bf16.mxu0 %v566_v0  ;;  %398 = vmatprep.mubr.msk.bf16.mxu0 %vm567_vm0, %v566_v0  ;;  %v87_v2 = vld [vmem:[#allocation2] sm:$0xf]  ;;  %v436_v3 = vld [vmem:[#allocation7] sm:$0xff]   ;;  %v437_v4 = vld [vmem:[#allocation7 + $0x8] sm:$0xff]   ;;  %vm172_vm2 = vcmask 261120   ;;  %s568_s23 = smov [#allocation10]  }
  0x4b   :  { %402 = vmatprep.subr.bf16.mxu1 %v566_v0  ;;  %406 = vmatprep.mubr.msk.bf16.mxu1 %vm567_vm0, %v566_v0  ;;  %v438_v5 = vld [vmem:[%s718_s5] sm:$0xff]   ;;  %v439_v14 = vld [vmem:[%s718_s5 + $0x8] sm:$0xff]   ;;  %v441_v24 = vld [vmem:[#allocation8 + $0x8] sm:$0xff]   ;;  %s359_s25 = sshll.u32 %s568_s23, 4  ;;  %s360_s25 = int_to_ptr.vmem [resolvable:$true] %s359_s25 }
  0x4c   :  { %397 = vmatpush3.bf16.msra.mxu0 %v435_v1  ;;  %403 = vmatpush3.bf16.msra.mxu1 %v436_v3  ;;  %v370_v6 = vld [vmem:[%s715_s2] ss:$0 sm:$0xff]  ;;  %v440_v15 = vld [vmem:[#allocation8] sm:$0xff]   ;;  %p535_p5 = scmp.lt.s32.totalorder %s360_s25, %s360_s25 }
  0x4d   :  { %410 = vmatprep.subr.bf16.mxu0 %v566_v0  ;;  %404 = vmatprep.subr.bf16.mxu1 %v566_v0  ;;  %v373_v16 = vld [vmem:[%s717_s4] ss:$0 sm:$0xff] }
  0x4e   :  { %v377_v25 = vld [vmem:[%s719_s6] ss:$0 sm:$0xff]  ;;  %s530_s6 = scalar_lea.vmem %s360_s25, 128 }
  0x4f   :  { %399 = vmatmul.mubr.msk.bf16.vlgmr.msra.gmra.mrb[0].mxu0 %vm103_vm1, %v87_v2  ;;  %v381_v33 = vld [vmem:[%s721_s8] ss:$0 sm:$0xff]  ;;  %p531_p4 = scmp.ne.s32.totalorder %s360_s25, %s530_s6  ;;  %p536_p6 = scmp.lt.s32.totalorder %s530_s6, %s530_s6 }
  0x50   :  { %414 = vmatprep.mubr.msk.bf16.mxu0 %vm567_vm0, %v566_v0  ;;  %405 = vmatpush3.bf16.msra.mxu1 %v437_v4 }
  0x51   :  { %418 = vmatprep.subr.bf16.mxu1 %v566_v0  ;;  %411 = vmatpush3.bf16.msra.mxu0 %v438_v5  ;;  %p537_p7 = por %p536_p6, %p535_p5 }
  0x52   :  { %412 = vmatprep.subr.bf16.mxu0 %v566_v0 }
  0x53   :  { %p538_p8 = pnand %p537_p7, %p531_p4 }
  0x55   :  { %413 = vmatpush3.bf16.msra.mxu0 %v439_v14 }
 0x122   :  { %v141_v7 = vpop.f32.mrb[0].mxu0 }
 0x123   :  { %v142_v8 = vadd.f32 %v370_v6, %v141_v7  ;;  %v400_v9 = vpop.f32.mrb[1].mxu0 }
 0x124   :  { %v144_v10 = vpop.f32.mrb[2].mxu0 }
 0x125   :  { %v147_v11 = vmax.f32 %v142_v8, 0.0  ;;  %v401_v12 = vpop.f32.mrb[3].mxu0 }
 0x127   :  { %v148_v13 = vpack.c.bf16 %v147_v11, %v147_v11 }
 0x129   :  { %407 = vmatmul.mubr.msk.bf16.vlgmr.msra.gmra.mrb[0].mxu1 %vm172_vm2, %v148_v13 }
 0x12a   :  { %422 = vmatprep.mubr.msk.bf16.mxu1 %vm567_vm0, %v566_v0  ;;  %419 = vmatpush3.bf16.msra.mxu1 %v440_v15 }
 0x12b   :  { %420 = vmatprep.subr.bf16.mxu1 %v566_v0 }
 0x12e   :  { %421 = vmatpush3.bf16.msra.mxu1 %v441_v24 }
 0x1fc   :  { %v210_v17 = vpop.f32.mrb[0].mxu1 }
 0x1fd   :  { %v211_v18 = vadd.f32 %v373_v16, %v210_v17  ;;  %v408_v19 = vpop.f32.mrb[1].mxu1 }
 0x1fe   :  { %v213_v20 = vpop.f32.mrb[2].mxu1 }
 0x1ff   :  { %v216_v21 = vmax.f32 %v211_v18, 0.0  ;;  %v409_v22 = vpop.f32.mrb[3].mxu1 }
 0x201   :  { %v217_v23 = vpack.c.bf16 %v216_v21, %v216_v21 }
 0x203   :  { %415 = vmatmul.mubr.msk.bf16.vlgmr.msra.gmra.mrb[4].mxu0 %vm172_vm2, %v217_v23 }
 0x2d6   :  { %v278_v26 = vpop.f32.mrb[4].mxu0 }
 0x2d7   :  { %v279_v27 = vadd.f32 %v377_v25, %v278_v26  ;;  %v416_v28 = vpop.f32.mrb[5].mxu0 }
 0x2d8   :  { %v281_v29 = vpop.f32.mrb[6].mxu0 }
 0x2d9   :  { %v284_v30 = vmax.f32 %v279_v27, 0.0  ;;  %v417_v31 = vpop.f32.mrb[7].mxu0 }
 0x2db   :  { %v285_v32 = vpack.c.bf16 %v284_v30, %v284_v30 }
 0x2dd   :  { %423 = vmatmul.mubr.msk.bf16.vlgmr.msra.gmra.mrb[4].mxu1 %vm172_vm2, %v285_v32 }
 0x3b0   :  { %v346_v34 = vpop.f32.mrb[4].mxu1 }
 0x3b1   :  { %v347_v35 = vadd.f32 %v381_v33, %v346_v34  ;;  %v424_v36 = vpop.f32.mrb[5].mxu1 }
 0x3b2   :  { %v349_v37 = vpop.f32.mrb[6].mxu1 }
 0x3b3   :  { %352 = vst [vmem:[#allocation10] sm:$0xff] %v347_v35  ;;  %v425_v38 = vpop.f32.mrb[7].mxu1 }
 0x3b4   :  { %541 = shalt.err (!%p538_p8)
}
 0x3b5   :  { %s542_s8 = scalar_lea.hbm %s722_s9, 128 }
 0x3b6   :  { %p543_p9 = scmp.ne.s32.totalorder %s722_s9, %s542_s8  ;;  %p546_p10 = scmp.lt.u32.totalorder %s542_s8, %s722_s9 }
 0x3b8   :  { %p548_p11 = pnand %p546_p10, %p543_p9 }
 0x3ba   :  { %551 = shalt.err (!%p548_p11)
}
 0x3bb   :  { %362 = dma.vmem_to_hbm [thread:$0]  %s360_s25, 128, %s722_s9, [#allocation4]  }
 0x3bc   :  { %558 = dma.done.wait [#allocation4], 128  }
 0x3bd   :  { %559 = vsyncadd [#allocation4], 4294967168 }
 0x3be   :  { %366 = vsyncpa [#allocation3], 1 }
 0x3bf   :  { %367 = vsyncpa [#allocation6], 1 }
 0x3c0   :  { %368 = vsyncpa [#allocation9], 1 }
 0x3c1   :  { %369 = vsyncpa [#allocation4], 1 }

</bundles_post_ra>
